<compile_context>
chip_gen: v5e
topology: v5e:2x2
jax: 0.10.0
libtpu: 0.0.40
codegen_flags: <defaults>
</compile_context>

<pallas_src>
import functools

import jax
import jax.numpy as jnp
from jax.experimental import pallas as pl
from jax.experimental.pallas import tpu as pltpu


def _avgpool_kernel(x_ref, o_ref, *, kernel_size, stride, l_out):
    # x_ref: (bt, T, ct) input tile; o_ref: (bt, l_out, ct) output tile.
    # Window element k across *all* output positions is one strided sublane
    # load:  x_ref[:, pl.ds(k, l_out, stride=stride), :].
    # Summing the K loads on the VPU gives the window sums; a single scalar
    # multiply by 1/kernel_size on the f32 accumulator finishes the mean.
    def window_slice(k):
        if stride == 1:
            return pl.ds(k, l_out)
        return pl.ds(k, l_out, stride=stride)

    acc = x_ref[:, window_slice(0), :].astype(jnp.float32)
    for k in range(1, kernel_size):  # kernel_size is small & static -> unrolled
        acc = acc + x_ref[:, window_slice(k), :].astype(jnp.float32)
    o_ref[...] = (acc * (1.0 / kernel_size)).astype(o_ref.dtype)


def _divisors(n):
    return [d for d in range(1, n + 1) if n % d == 0]


def _physical_vmem_bytes():
    """Physical VMEM of the current chip; conservative fallback = v7x per-TC (64 MiB)."""
    try:
        info = pltpu.get_tpu_info()
        cap = getattr(info, "vmem_capacity_bytes", None)
        if cap:
            return int(cap)
    except Exception:
        pass
    return 64 << 20


def _footprint_bytes(bt, ct, T, l_out, itemsize):
    """Per-grid-step live VMEM: 2x input (double-buffered) + 2x output + f32 acc temps."""
    in_b = bt * T * ct * itemsize
    out_b = bt * l_out * ct * itemsize
    acc_b = bt * l_out * ct * 4  # f32 accumulator
    return 2 * in_b + 2 * out_b + 2 * acc_b  # 2x acc: one extra live temp during the adds


def _choose_tiling(B, T, C, l_out, itemsize, budget_bytes):
    """Pick (bt, ct): lane-dense channel chunks, footprint-bounded tiles, >=2 grid steps."""
    # Channel tile: multiples of 128 that divide C (lane-dense vld/vst). If C is
    # not a multiple of 128, the BlockSpec constraint forces the full C.
    if C % 128 == 0:
        ct_candidates = [d * 128 for d in _divisors(C // 128)]  # ascending
    else:
        ct_candidates = [C]
    ct = ct_candidates[0]
    for cand in ct_candidates:  # ascending -> ends on the largest within budget
        if _footprint_bytes(1, cand, T, l_out, itemsize) <= budget_bytes:
            ct = cand
    # Batch tile: largest divisor of B keeping the full footprint within budget.
    bt = 1
    for cand in _divisors(B):  # ascending
        if _footprint_bytes(cand, ct, T, l_out, itemsize) <= budget_bytes:
            bt = cand

    # Occupancy: hard-require >= 2 grid steps (v7x shards the "parallel" axes
    # across its 2 TensorCores), and aim for >= 4 on large problems so per-TC
    # double-buffering stays overlapped. Stop splitting once tiles would be tiny.
    hard_min, soft_target = 2, 4
    while True:
        steps = (B // bt) * (C // ct)
        if steps >= soft_target:
            break
        if steps >= hard_min and bt * T * ct * itemsize < (1 << 20):
            break
        new_bt, new_ct = bt, ct
        smaller_bt = [d for d in _divisors(B) if d < bt]
        smaller_ct = [c for c in ct_candidates if c < ct]
        if smaller_bt:
            new_bt = max(smaller_bt)
        elif smaller_ct:
            new_ct = max(smaller_ct)
        if (new_bt, new_ct) == (bt, ct):
            break  # cannot split further (e.g. B == 1 and C < 256)
        bt, ct = new_bt, new_ct
    return bt, ct


def avg_pool(x, kernel_size, stride=None):
    """Equivalent of AvgPool(kernel_size, stride).forward(x) with x of shape (B, T, C)."""
    if stride is None:
        stride = kernel_size  # nn.AvgPool1d default when stride is omitted
    B, T, C = x.shape
    l_out = (T - kernel_size) // stride + 1
    assert l_out >= 1, "sequence too short for this kernel_size/stride"
    itemsize = jnp.dtype(x.dtype).itemsize

    physical_vmem = _physical_vmem_bytes()
    # ~45% of physical VMEM for the live per-step footprint, capped at 48 MiB so
    # a v6e-sized tile is never ported unchanged onto v7x's 64 MiB per-TC VMEM.
    budget = min(int(0.45 * physical_vmem), 48 << 20)
    bt, ct = _choose_tiling(B, T, C, l_out, itemsize, budget)
    fp = _footprint_bytes(bt, ct, T, l_out, itemsize)
    # Explicit scoped-VMEM limit with ~30% headroom over the real footprint
    # (v5e's 16 MiB default scoped limit would otherwise reject large tiles),
    # capped well below physical VMEM.
    vmem_limit = int(max(16 << 20, min(int(0.71 * physical_vmem), int(1.3 * fp))))

    # TODO(synk): for very long sequences (whole-T tile no longer fits even at
    # ct=128) tile l_out with halo'd element-indexed input blocks instead.
    # TODO(synk): for C < 128 the stores are masked partial vst; a lane-dense
    # (T, B*C) repack would require fusing the upstream permute, so it is not done here.

    grid = (B // bt, C // ct)
    kernel = functools.partial(
        _avgpool_kernel, kernel_size=kernel_size, stride=stride, l_out=l_out
    )

    return pl.pallas_call(
        kernel,
        out_shape=jax.ShapeDtypeStruct((B, l_out, C), x.dtype),
        grid=grid,
        in_specs=[pl.BlockSpec((bt, T, ct), lambda b, c: (b, 0, c))],
        out_specs=pl.BlockSpec((bt, l_out, ct), lambda b, c: (b, 0, c)),
        compiler_params=pltpu.CompilerParams(
            dimension_semantics=("parallel", "parallel"),
            vmem_limit_bytes=vmem_limit,
        ),
    )(x)


def avg_pool_ref(x, kernel_size, stride):
    """Pure-JAX reference matching nn.AvgPool1d semantics on (B, T, C)."""
    B, T, C = x.shape
    l_out = (T - kernel_size) // stride + 1
    cols = [
        jnp.mean(x[:, l * stride:l * stride + kernel_size, :], axis=1)
        for l in range(l_out)
    ]
    return jnp.stack(cols, axis=1)


if __name__ == "__main__":
    # Case 1: typical small module shape (B, T, C) with AvgPool1d(kernel=4, stride=2).
    key = jax.random.PRNGKey(0)
    B, T, C = 2, 16, 32
    kernel_size, stride = 4, 2
    x = jax.random.normal(key, (B, T, C), dtype=jnp.float32)

    out = jax.block_until_ready(avg_pool(x, kernel_size, stride))
    ref = avg_pool_ref(x, kernel_size, stride)
    assert out.shape == ref.shape, (out.shape, ref.shape)
    assert jnp.allclose(out, ref, atol=1e-5, rtol=1e-5), "mismatch vs reference (case 1)"

    # Case 2: lane-dense channels with B == 1 (exercises the >=2-step occupancy split).
    B2, T2, C2 = 1, 64, 256
    k2, s2 = 5, 3
    x2 = jax.random.normal(jax.random.PRNGKey(0), (B2, T2, C2), dtype=jnp.float32)

    out2 = jax.block_until_ready(avg_pool(x2, k2, s2))
    ref2 = avg_pool_ref(x2, k2, s2)
    assert out2.shape == ref2.shape, (out2.shape, ref2.shape)
    assert jnp.allclose(out2, ref2, atol=1e-5, rtol=1e-5), "mismatch vs reference (case 2)"

    print("KERNEL_OK")
</pallas_src>

<mosaic_0001>
module attributes {stable_mosaic.version = 11 : i64} {
  func.func @_avgpool_kernel(%arg0: i32, %arg1: i32, %arg2: memref<1x16x32xf32, #tpu.memory_space<vmem>>, %arg3: memref<1x7x32xf32, #tpu.memory_space<vmem>>) attributes {dimension_semantics = [#tpu.dimension_semantics<parallel>, #tpu.dimension_semantics<parallel>], iteration_bounds = array<i64: 2, 1>, scalar_prefetch = 0 : i64, scratch_operands = 0 : i64, tpu.core_type = #tpu.core_type<tc>, window_params = [{transform_indices = @transform_0, window_bounds = array<i64: 1, 16, 32>}, {transform_indices = @transform_1, window_bounds = array<i64: 1, 7, 32>}]} {
    %c0 = arith.constant 0 : index
    %c0_0 = arith.constant 0 : index
    %c0_1 = arith.constant 0 : index
    %0 = tpu.strided_load %arg2[%c0, %c0_0, %c0_1] {strides = array<i32: 1, 2, 1>} : memref<1x16x32xf32, #tpu.memory_space<vmem>>, vector<1x7x32xf32>
    %c0_2 = arith.constant 0 : index
    %c1 = arith.constant 1 : index
    %c0_3 = arith.constant 0 : index
    %1 = tpu.strided_load %arg2[%c0_2, %c1, %c0_3] {strides = array<i32: 1, 2, 1>} : memref<1x16x32xf32, #tpu.memory_space<vmem>>, vector<1x7x32xf32>
    %2 = arith.addf %0, %1 : vector<1x7x32xf32>
    %c0_4 = arith.constant 0 : index
    %c2 = arith.constant 2 : index
    %c0_5 = arith.constant 0 : index
    %3 = tpu.strided_load %arg2[%c0_4, %c2, %c0_5] {strides = array<i32: 1, 2, 1>} : memref<1x16x32xf32, #tpu.memory_space<vmem>>, vector<1x7x32xf32>
    %4 = arith.addf %2, %3 : vector<1x7x32xf32>
    %c0_6 = arith.constant 0 : index
    %c3 = arith.constant 3 : index
    %c0_7 = arith.constant 0 : index
    %5 = tpu.strided_load %arg2[%c0_6, %c3, %c0_7] {strides = array<i32: 1, 2, 1>} : memref<1x16x32xf32, #tpu.memory_space<vmem>>, vector<1x7x32xf32>
    %6 = arith.addf %4, %5 : vector<1x7x32xf32>
    %cst = arith.constant 2.500000e-01 : f32
    %7 = vector.broadcast %cst : f32 to vector<1x7x32xf32>
    %8 = arith.mulf %6, %7 : vector<1x7x32xf32>
    %c0_8 = arith.constant 0 : index
    %c0_9 = arith.constant 0 : index
    %c0_10 = arith.constant 0 : index
    %9 = vector.load %arg3[%c0_8, %c0_9, %c0_10] : memref<1x7x32xf32, #tpu.memory_space<vmem>>, vector<1x7x32xf32>
    tpu.vector_store %arg3[%c0_8, %c0_9, %c0_10], %8 {strides = array<i32>} : memref<1x7x32xf32, #tpu.memory_space<vmem>>, vector<1x7x32xf32>,
    return
  }
  func.func @transform_0(%arg0: i32, %arg1: i32) -> (i32, i32, i32) {
    %c0_i32 = arith.constant 0 : i32
    %c0_i32_0 = arith.constant 0 : i32
    return %arg0, %c0_i32, %arg1 : i32, i32, i32
  }
  func.func @transform_1(%arg0: i32, %arg1: i32) -> (i32, i32, i32) {
    %c0_i32 = arith.constant 0 : i32
    %c0_i32_0 = arith.constant 0 : i32
    return %arg0, %c0_i32, %arg1 : i32, i32, i32
  }
}

</mosaic_0001>

<bundles_post_ra>
// kernel: tpu_custom_call.1
= control target key start
LH: loop header
LB: loop body
LE: loop exit
PB: predicated region body
PF: predicated region fallthrough
CT: control target
= control target key end

     0   :  { %6 = vsyncpa [#allocation3], 0  ;;  %s513_s0 = inlined_call_operand.hbm [shape: f32[2,16,32], index: 0, kind: input, shape index: {}]   ;;  %s514_s1 = inlined_call_operand.vmem [shape: f32[2,7,32], index: 1, kind: output, shape index: {}]  }
   0x1   :  { %8 = vsyncpa [#allocation3 + $0x1], 0  ;;  %s425_s6 = smov 0   ;;  %s427_s7 = smov 0  }
   0x2   :  { %s429_s8 = smov 0   ;;  %s431_s9 = smov 0  }
   0x3   :  { %s433_s10 = smov 0   ;;  %s435_s11 = smov 0  }
   0x4 LB: > { %s258_s12 = sadd.s32 4294967295, %s411_s11   ;;  %s26_s13 = sadd.s32 1, %s407_s10  ;;  %s411_s11 = sphi %s435_s11, %s14_s11   ;;  %s407_s10 = sphi %s433_s10, %s521_s10   ;;  %s403_s9 = sphi %s431_s9, %s520_s9   ;;  %s399_s8 = sphi %s429_s8, %s519_s8   ;;  %s395_s7 = sphi %s427_s7, %s518_s7   ;;  %s391_s6 = sphi %s425_s6, %s517_s6  }
   0x5   : > { %p28_p0 = scmp.ge.s32.totalorder %s26_s13, 2  ;;  %s35_s14 = sadd.s32 1, %s399_s8 }
   0x6   : > { %p42_p1 = scmp.ne.s32.totalorder %s399_s8, %s395_s7  ;;  %p43_p2 = scmp.eq.s32.totalorder %s411_s11, 0 }
   0x7   : > { %s523_s13 = smov (%p28_p0, %s26_s13), 0  ;;  %p48_p4 = scmp.ne.s32.totalorder %s395_s7, %s391_s6 }
   0x8   : > { %p461_p3 = por %p43_p2, %p42_p1  ;;  %s30_s16 = ssub.s32 %s407_s10, %s523_s13 }
   0x9   : > { %p49_p5 = scmp.eq.s32.totalorder %s258_s12, 0  ;;  %p33_p6 = scmp.eq.s32.totalorder %s30_s16, 0 }
   0xa   : > { %p280_p8 = scmp.lt.s32.totalorder %s411_s11, 2  ;;  %s100_s19 = sand.u32 1, %s399_s8  }
   0xb   : > { %p468_p7 = por %p49_p5, %p48_p4  ;;  %s273_s20 = sshll.u32 %s407_s10, 4 }
   0xc   : > { %s474_s18 = scalar_select %p33_p6, %s399_s8, %s35_s14  }
   0xd   : > { %s262_s21 = sshll.u32 %s100_s19, 4  ;;  %s110_s24 = scalar_lea.hbm %s513_s0, %s273_s20 }
   0xe   : > { %s111_s25 = sshll.u32 %s110_s24, 4  ;;  %s104_s26 = scalar_lea.vmem [#allocation2], %s262_s21  ;;  %s112_s25 = int_to_ptr.hbm [resolvable:$true] %s111_s25 }
   0xf   : > { %s113_s27 = sshll.u32 %s104_s26, 4  ;;  %p277_p9 = pnand %p280_p8, %p461_p3  ;;  %s114_s27 = int_to_ptr.vmem [resolvable:$true] %s113_s27 }
  0x10   : > { %p265_p10 = scmp.ge.s32.totalorder %s411_s11, 1  ;;  %p121_p11 = scmp.lt.s32.totalorder %s411_s11, 3 }
  0x11   : > { %s101_s28 = scalar_lea.sflag [#allocation3], %s100_s19  ;;  %s413_s29 = smov 128  }
  0x12   : > { %s414_s30 = smov 8   ;;  %p122_p12 = pnand %p265_p10, %p121_p11 }
  0x13   : > { %279 = dma.hbm_to_vmem [thread:$0]  (!%p277_p9), %s112_s25, 256, %s114_s27, %s101_s28, %s413_s29, %s413_s29, %s414_s30  }
  0x14   : > { %125 = sbr.rel (%p122_p12) target bundleno = 37 (0x25), region = 24  ;;  %s127_s2 = sand.u32 (!%p122_p12), 1, %s395_s7  }
  0x15   : > { %s266_s3 = sshll.u32 (!%p122_p12), %s127_s2, 4  ;;  %s128_s4 = scalar_lea.sflag (!%p122_p12), [#allocation3], %s127_s2 }
  0x16   : > { %s131_s5 = scalar_lea.vmem (!%p122_p12), [#allocation2], %s266_s3 }
  0x19   : > { %386 = dma.done.wait (%p468_p7), %s128_s4, 256  }
  0x1a   : > { %388 = vsyncadd (%p468_p7), %s128_s4, 4294967040  ;;  %p153_p13 = scmp.lt.s32.totalorder %s403_s9, 1  ;;  %v160_v0 = vld [vmem:[%s131_s5] ss:$2 sm:$0x7f]  ;;  %vm171_vm0 = vcmask 260096  }
  0x1b   : > { %v268_v1 = vld [vmem:[%s131_s5 + $0x1] ss:$2 sm:$0x7f]  ;;  %v269_v3 = vld [vmem:[%s131_s5 + $0x2] ss:$2 sm:$0x7f] }
  0x1c   : > { %s525_s9 = smov (!%p153_p13, %s403_s9), 1  ;;  %v163_v2 = vadd.f32 %v268_v1, %v160_v0  ;;  %v270_v4 = vld [vmem:[%s131_s5 + $0x3] ss:$2 sm:$0x7f] }
  0x1d   : > { %s267_s6 = sshll.u32 %s525_s9, 3 }
  0x1e   : > { %v166_v5 = vadd.f32 %v269_v3, %v163_v2  ;;  %s159_s15 = scalar_lea.vmem %s514_s1, %s267_s6 }
  0x20   : > { %v169_v6 = vadd.f32 %v270_v4, %v166_v5 }
  0x22   : > { %v170_v7 = vmul.f32 0.25, %v169_v6 }
  0x24   : > { %172 = vst.msk [vmem:[%s159_s15] sm:$0x7f] %vm171_vm0, %v170_v7 }
  0x25 PF: > { %s14_s11 = sadd.s32 1, %s411_s11   ;;  %s517_s6 = smov %s395_s7 }
  0x26   : > { %p11_p0 = scmp.ge.s32.totalorder %s14_s11, 4   ;;  %s518_s7 = smov %s399_s8 }
  0x27   : > { %s519_s8 = smov %s474_s18  ;;  %s520_s9 = smov %s407_s10 }
  0x28   : > { %s521_s10 = smov %s523_s13  ;;  %13 = sbr.rel (!%p11_p0) target bundleno = 4 (0x4), region = 67 }
  0x2d   :  { %198 = vsyncpa [#allocation3], 1 }
  0x2e   :  { %200 = vsyncpa [#allocation3 + $0x1], 1 }

</bundles_post_ra>
